<compile_context>
chip_gen: v6e
topology: v6e:2x2x1
jax: 0.10.0
libtpu: 0.0.40
codegen_flags: <defaults>
</compile_context>

<pallas_src>
import functools

import jax
import jax.numpy as jnp
from jax import lax
from jax.experimental import pallas as pl
from jax.experimental.pallas import tpu as pltpu

BN_EPS = 1e-5
LEAKY_SLOPE = 0.1
LANE = 128
SUBLANE = 8

_VMEM_LIMIT_BYTES = 32 * 1024 * 1024  # fits v7x's default scoped budget too


def _round_up(x, m):
    return (x + m - 1) // m * m


def _choose_tile_m(m_rows, tile_k, cp, budget_bytes=20 * 1024 * 1024):
    """Largest power-of-two M tile whose double-buffered working set fits budget."""
    tm = 2048
    while tm > SUBLANE:
        need = 4 * (2 * tm * tile_k          # double-buffered patch tiles
                    + 2 * tile_k * cp        # double-buffered weight tiles
                    + 2 * tm * cp            # double-buffered y tiles
                    + tm * cp                # f32 accumulator scratch
                    + 4 * SUBLANE * cp)      # per-tile stats blocks
        if need <= budget_bytes:
            break
        tm //= 2
    tm = max(tm, SUBLANE)
    tm = min(tm, _round_up(max(m_rows, 1), SUBLANE))
    return _round_up(tm, SUBLANE)


# ---------- pass 1: tiled conv matmul (MXU) + per-tile BN partial statistics --

def _conv_stats_kernel(x_ref, w_ref, y_ref, sum_ref, sq_ref, acc_ref):
    # x_ref: [TM, TK] im2col patches, w_ref: [TK, Cp] weights.
    k = pl.program_id(1)
    nk = pl.num_programs(1)

    @pl.when(k == 0)
    def _():
        acc_ref[...] = jnp.zeros_like(acc_ref)

    acc_ref[...] += jnp.dot(x_ref[...], w_ref[...],
                            preferred_element_type=jnp.float32)

    @pl.when(k == nk - 1)
    def _():
        y = acc_ref[...]
        y_ref[...] = y
        s = jnp.sum(y, axis=0)[None, None, :]        # [1, 1, Cp]
        sq = jnp.sum(y * y, axis=0)[None, None, :]   # [1, 1, Cp]
        # Replicate across the 8 sublanes so the stats store stays (8,128)-aligned.
        sum_ref[...] = jnp.broadcast_to(s, sum_ref.shape)
        sq_ref[...] = jnp.broadcast_to(sq, sq_ref.shape)


# ---------- pass 2: fused BatchNorm affine + LeakyReLU (in place) --------------

def _bn_lrelu_kernel(y_ref, scale_ref, shift_ref, o_ref):
    z = y_ref[...] * scale_ref[...] + shift_ref[...]
    o_ref[...] = jnp.where(z > 0, z, LEAKY_SLOPE * z)


def _im2col(x, kernel_size, stride, padding):
    """x: [N, Cin, H, W] -> patches [N*OH*OW, Cin*KH*KW], plus (OH, OW)."""
    N, C, H, W = x.shape
    KH = KW = kernel_size
    s, p = stride, padding
    OH = (H + 2 * p - KH) // s + 1
    OW = (W + 2 * p - KW) // s + 1

    xp = jnp.pad(x, ((0, 0), (0, 0), (p, p), (p, p)))
    cols = []
    for kh in range(KH):
        for kw in range(KW):
            cols.append(xp[:, :, kh:kh + s * OH:s, kw:kw + s * OW:s])  # [N,C,OH,OW]
    patches = jnp.stack(cols, axis=2)                     # [N, C, KH*KW, OH, OW]
    patches = jnp.transpose(patches, (0, 3, 4, 1, 2))     # [N, OH, OW, C, KH*KW]
    patches = patches.reshape(N * OH * OW, C * KH * KW)
    return patches, OH, OW


@functools.partial(
    jax.jit,
    static_argnames=("kernel_size", "stride", "padding", "tile_m", "tile_k"))
def conv_block(x, weight, bias, gamma, beta, *,
               kernel_size, stride, padding, tile_m=None, tile_k=None):
    """CONV.forward:  LeakyReLU(BatchNorm(Conv2d(x))).

    x:      [N, Cin, H, W]   (NCHW, float32)
    weight: [Cout, Cin, KH, KW]
    bias, gamma, beta: [Cout]
    returns [N, Cout, OH, OW] (NCHW, float32)
    """
    del bias  # Exactly cancelled by the BatchNorm mean subtraction.

    N = x.shape[0]
    C_out = weight.shape[0]

    patches, OH, OW = _im2col(x, kernel_size, stride, padding)  # [M, K]
    M, K = patches.shape
    Cp = _round_up(C_out, LANE)                                 # lane-dense channels

    # ---- K (reduction) tiling: single step when K is small (no K padding) ----
    if tile_k is None:
        tile_k = K if K <= 2048 else 512
    tile_k = int(tile_k)
    if tile_k < K:
        tile_k = _round_up(tile_k, LANE)
    if tile_k >= K:
        tile_k, Kp = K, K
    else:
        Kp = _round_up(K, tile_k)
    nk = Kp // tile_k

    # ---- M tiling -------------------------------------------------------------
    if tile_m is None:
        tile_m = _choose_tile_m(M, tile_k, Cp)
    tile_m = _round_up(max(SUBLANE, min(int(tile_m), _round_up(M, SUBLANE))), SUBLANE)
    Mp = _round_up(M, tile_m)
    nt = Mp // tile_m

    patches_p = jnp.pad(patches.astype(jnp.float32), ((0, Mp - M), (0, Kp - K)))
    w_mat = weight.reshape(C_out, K).T.astype(jnp.float32)      # [K, Cout]
    w_p = jnp.pad(w_mat, ((0, Kp - K), (0, Cp - C_out)))        # [Kp, Cp]

    # ---------------- pass 1: tiled conv + partial stats ----------------
    flops1 = 2 * Mp * Kp * Cp
    w_traffic = Kp * Cp * (nt if nk > 1 else 1)  # weights re-streamed per M tile
    bytes1 = 4 * (Mp * Kp + w_traffic + Mp * Cp + 2 * nt * SUBLANE * Cp)
    y_full, psum, psq = pl.pallas_call(
        _conv_stats_kernel,
        out_shape=(
            jax.ShapeDtypeStruct((Mp, Cp), jnp.float32),
            jax.ShapeDtypeStruct((nt, SUBLANE, Cp), jnp.float32),
            jax.ShapeDtypeStruct((nt, SUBLANE, Cp), jnp.float32),
        ),
        grid_spec=pltpu.PrefetchScalarGridSpec(
            num_scalar_prefetch=0,
            grid=(nt, nk),
            in_specs=[
                pl.BlockSpec((tile_m, tile_k), lambda i, k: (i, k)),
                pl.BlockSpec((tile_k, Cp), lambda i, k: (k, 0)),
            ],
            out_specs=[
                pl.BlockSpec((tile_m, Cp), lambda i, k: (i, 0)),
                pl.BlockSpec((1, SUBLANE, Cp), lambda i, k: (i, 0, 0)),
                pl.BlockSpec((1, SUBLANE, Cp), lambda i, k: (i, 0, 0)),
            ],
            scratch_shapes=[pltpu.VMEM((tile_m, Cp), jnp.float32)],
        ),
        compiler_params=pltpu.CompilerParams(
            dimension_semantics=("parallel", "arbitrary"),
            vmem_limit_bytes=_VMEM_LIMIT_BYTES),
        cost_estimate=pl.CostEstimate(
            flops=int(flops1), transcendentals=0, bytes_accessed=int(bytes1)),
    )(patches_p, w_p)

    # -------- tiny host-side reduction of per-tile stats -> scale/shift --------
    m = jnp.float32(M)  # padded rows are exact zeros -> contribute nothing
    tot = jnp.sum(psum[:, 0, :], axis=0)
    tot_sq = jnp.sum(psq[:, 0, :], axis=0)
    mean = tot / m
    var = jnp.maximum(tot_sq / m - mean * mean, 0.0)  # biased batch variance
    gamma_p = jnp.pad(gamma.astype(jnp.float32), (0, Cp - C_out))
    beta_p = jnp.pad(beta.astype(jnp.float32), (0, Cp - C_out))
    inv = lax.rsqrt(var + BN_EPS)
    scale = (gamma_p * inv).reshape(1, Cp)
    shift = (beta_p - mean * gamma_p * inv).reshape(1, Cp)

    # ---------------- pass 2: in-place BN affine + LeakyReLU ----------------
    flops2 = 3 * Mp * Cp
    bytes2 = 4 * (2 * Mp * Cp + 2 * Cp)
    out = pl.pallas_call(
        _bn_lrelu_kernel,
        out_shape=jax.ShapeDtypeStruct((Mp, Cp), jnp.float32),
        grid_spec=pltpu.PrefetchScalarGridSpec(
            num_scalar_prefetch=0,
            grid=(nt,),
            in_specs=[
                pl.BlockSpec((tile_m, Cp), lambda i: (i, 0)),
                pl.BlockSpec((1, Cp), lambda i: (0, 0)),
                pl.BlockSpec((1, Cp), lambda i: (0, 0)),
            ],
            out_specs=pl.BlockSpec((tile_m, Cp), lambda i: (i, 0)),
        ),
        input_output_aliases={0: 0},  # normalize y in place, no extra HBM buffer
        compiler_params=pltpu.CompilerParams(
            dimension_semantics=("parallel",),
            vmem_limit_bytes=_VMEM_LIMIT_BYTES),
        cost_estimate=pl.CostEstimate(
            flops=int(flops2), transcendentals=0, bytes_accessed=int(bytes2)),
    )(y_full, scale, shift)

    out = out[:M, :C_out].reshape(N, OH, OW, C_out)
    # TODO(synk): for chained CONV blocks keep NHWC end-to-end; this transpose
    # only preserves the PyTorch NCHW output contract.
    return jnp.transpose(out, (0, 3, 1, 2))


def _reference(x, weight, bias, gamma, beta, *, kernel_size, stride, padding):
    """Pure-JAX reference (same semantics as the PyTorch module in train mode)."""
    y = lax.conv_general_dilated(
        x, weight,
        window_strides=(stride, stride),
        padding=[(padding, padding), (padding, padding)],
        dimension_numbers=("NCHW", "OIHW", "NCHW"),
    ) + bias.reshape(1, -1, 1, 1)
    mean = jnp.mean(y, axis=(0, 2, 3), keepdims=True)
    var = jnp.mean((y - mean) ** 2, axis=(0, 2, 3), keepdims=True)
    z = (y - mean) * lax.rsqrt(var + BN_EPS)
    z = z * gamma.reshape(1, -1, 1, 1) + beta.reshape(1, -1, 1, 1)
    return jnp.where(z > 0, z, LEAKY_SLOPE * z)


def _run_case(key, N, Cin, Cout, H, W, k, s, p, tile_m, tile_k):
    kx, kw, kb, kg, ke = jax.random.split(key, 5)
    x = jax.random.normal(kx, (N, Cin, H, W), dtype=jnp.float32)
    fan_in = Cin * k * k
    bound = 1.0 / (fan_in ** 0.5)
    weight = jax.random.uniform(kw, (Cout, Cin, k, k),
                                minval=-bound, maxval=bound, dtype=jnp.float32)
    bias = jax.random.uniform(kb, (Cout,), minval=-bound, maxval=bound,
                              dtype=jnp.float32)
    gamma = 1.0 + 0.1 * jax.random.normal(kg, (Cout,), dtype=jnp.float32)
    beta = 0.1 * jax.random.normal(ke, (Cout,), dtype=jnp.float32)

    out = conv_block(x, weight, bias, gamma, beta,
                     kernel_size=k, stride=s, padding=p,
                     tile_m=tile_m, tile_k=tile_k)
    out = jax.block_until_ready(out)

    ref = _reference(x, weight, bias, gamma, beta,
                     kernel_size=k, stride=s, padding=p)
    OH = (H + 2 * p - k) // s + 1
    OW = (W + 2 * p - k) // s + 1
    assert out.shape == (N, Cout, OH, OW)
    assert jnp.allclose(out, ref, atol=1e-4, rtol=1e-4), "mismatch vs reference"


if __name__ == "__main__":
    key = jax.random.PRNGKey(0)
    k1, k2 = jax.random.split(key)

    # Case 1: CONV(4 -> 8, k3 s1 p1), N=2, 16x16.  tile_m=128 -> M=512 splits
    # into 4 grid steps, exercising the cross-tile batch-norm statistics path.
    _run_case(k1, N=2, Cin=4, Cout=8, H=16, W=16, k=3, s=1, p=1,
              tile_m=128, tile_k=None)

    # Case 2: CONV(16 -> 32, k3 s2 p1), N=2, 16x16.  tile_k=128 forces the
    # K-reduction grid axis (K=144 -> padded 256, 2 steps) + accumulator path.
    _run_case(k2, N=2, Cin=16, Cout=32, H=16, W=16, k=3, s=2, p=1,
              tile_m=128, tile_k=128)

    print("KERNEL_OK")
</pallas_src>

<mosaic_0001>
module attributes {stable_mosaic.version = 11 : i64} {
  func.func @_conv_stats_kernel(%arg0: i32, %arg1: i32, %arg2: memref<128x36xf32, #tpu.memory_space<vmem>>, %arg3: memref<36x128xf32, #tpu.memory_space<vmem>>, %arg4: memref<128x128xf32, #tpu.memory_space<vmem>>, %arg5: memref<1x8x128xf32, #tpu.memory_space<vmem>>, %arg6: memref<1x8x128xf32, #tpu.memory_space<vmem>>, %arg7: memref<128x128xf32, #tpu.memory_space<vmem>>) attributes {dimension_semantics = [#tpu.dimension_semantics<parallel>, #tpu.dimension_semantics<arbitrary>], iteration_bounds = array<i64: 4, 1>, scalar_prefetch = 0 : i64, scratch_operands = 1 : i64, tpu.core_type = #tpu.core_type<tc>, window_params = [{transform_indices = @transform_0, window_bounds = array<i64: 128, 36>}, {transform_indices = @transform_1, window_bounds = array<i64: 36, 128>}, {transform_indices = @transform_2, window_bounds = array<i64: 128, 128>}, {transform_indices = @transform_3, window_bounds = array<i64: 1, 8, 128>}, {transform_indices = @transform_4, window_bounds = array<i64: 1, 8, 128>}]} {
    %c0_i32 = arith.constant 0 : i32
    %0 = arith.cmpi eq, %arg1, %c0_i32 : i32
    %1 = arith.extui %0 : i1 to i32
    %c0_i32_0 = arith.constant 0 : i32
    %2 = arith.cmpi ne, %1, %c0_i32_0 : i32
    scf.if %2 {
      %cst_10 = arith.constant 0.000000e+00 : f32
      %12 = vector.broadcast %cst_10 : f32 to vector<128x128xf32>
      %c0_11 = arith.constant 0 : index
      %c0_12 = arith.constant 0 : index
      %13 = vector.load %arg7[%c0_11, %c0_12] : memref<128x128xf32, #tpu.memory_space<vmem>>, vector<128x128xf32>
      tpu.vector_store %arg7[%c0_11, %c0_12], %12 {strides = array<i32>} : memref<128x128xf32, #tpu.memory_space<vmem>>, vector<128x128xf32>,
    } else {
    }
    %c0 = arith.constant 0 : index
    %c0_1 = arith.constant 0 : index
    %3 = vector.load %arg7[%c0, %c0_1] : memref<128x128xf32, #tpu.memory_space<vmem>>, vector<128x128xf32>
    %c0_2 = arith.constant 0 : index
    %c0_3 = arith.constant 0 : index
    %4 = vector.load %arg2[%c0_2, %c0_3] : memref<128x36xf32, #tpu.memory_space<vmem>>, vector<128x36xf32>
    %c0_4 = arith.constant 0 : index
    %c0_5 = arith.constant 0 : index
    %5 = vector.load %arg3[%c0_4, %c0_5] : memref<36x128xf32, #tpu.memory_space<vmem>>, vector<36x128xf32>
    %cst = arith.constant dense<0.000000e+00> : vector<128x128xf32>
    %6 = tpu.matmul %4, %5, %cst {dimension_numbers = #tpu.dot_dimension_numbers<[1], [0], [0], [1], [0, 0, 1, 1], [], []>} : vector<128x36xf32>, vector<36x128xf32>, vector<128x128xf32> -> vector<128x128xf32>
    %7 = arith.addf %3, %6 : vector<128x128xf32>
    %c0_6 = arith.constant 0 : index
    %c0_7 = arith.constant 0 : index
    %8 = vector.load %arg7[%c0_6, %c0_7] : memref<128x128xf32, #tpu.memory_space<vmem>>, vector<128x128xf32>
    tpu.vector_store %arg7[%c0_6, %c0_7], %7 {strides = array<i32>} : memref<128x128xf32, #tpu.memory_space<vmem>>, vector<128x128xf32>,
    %c0_i32_8 = arith.constant 0 : i32
    %9 = arith.cmpi eq, %arg1, %c0_i32_8 : i32
    %10 = arith.extui %9 : i1 to i32
    %c0_i32_9 = arith.constant 0 : i32
    %11 = arith.cmpi ne, %10, %c0_i32_9 : i32
    scf.if %11 {
      %c0_10 = arith.constant 0 : index
      %c0_11 = arith.constant 0 : index
      %12 = vector.load %arg7[%c0_10, %c0_11] : memref<128x128xf32, #tpu.memory_space<vmem>>, vector<128x128xf32>
      %c0_12 = arith.constant 0 : index
      %c0_13 = arith.constant 0 : index
      %13 = vector.load %arg4[%c0_12, %c0_13] : memref<128x128xf32, #tpu.memory_space<vmem>>, vector<128x128xf32>
      tpu.vector_store %arg4[%c0_12, %c0_13], %12 {strides = array<i32>} : memref<128x128xf32, #tpu.memory_space<vmem>>, vector<128x128xf32>,
      %cst_14 = arith.constant dense<0.000000e+00> : vector<128xf32>
      %14 = vector.multi_reduction <add>, %12, %cst_14 [0] : vector<128x128xf32> to vector<128xf32>
      %15 = vector.shape_cast %14 : vector<128xf32> to vector<1x1x128xf32>
      %16 = arith.mulf %12, %12 : vector<128x128xf32>
      %cst_15 = arith.constant dense<0.000000e+00> : vector<128xf32>
      %17 = vector.multi_reduction <add>, %16, %cst_15 [0] : vector<128x128xf32> to vector<128xf32>
      %18 = vector.shape_cast %17 : vector<128xf32> to vector<1x1x128xf32>
      %19 = vector.shape_cast %15 : vector<1x1x128xf32> to vector<1x1x128xf32>
      %20 = vector.broadcast %19 : vector<1x1x128xf32> to vector<1x8x128xf32>
      %c0_16 = arith.constant 0 : index
      %c0_17 = arith.constant 0 : index
      %c0_18 = arith.constant 0 : index
      %21 = vector.load %arg5[%c0_16, %c0_17, %c0_18] : memref<1x8x128xf32, #tpu.memory_space<vmem>>, vector<1x8x128xf32>
      tpu.vector_store %arg5[%c0_16, %c0_17, %c0_18], %20 {strides = array<i32>} : memref<1x8x128xf32, #tpu.memory_space<vmem>>, vector<1x8x128xf32>,
      %22 = vector.shape_cast %18 : vector<1x1x128xf32> to vector<1x1x128xf32>
      %23 = vector.broadcast %22 : vector<1x1x128xf32> to vector<1x8x128xf32>
      %c0_19 = arith.constant 0 : index
      %c0_20 = arith.constant 0 : index
      %c0_21 = arith.constant 0 : index
      %24 = vector.load %arg6[%c0_19, %c0_20, %c0_21] : memref<1x8x128xf32, #tpu.memory_space<vmem>>, vector<1x8x128xf32>
      tpu.vector_store %arg6[%c0_19, %c0_20, %c0_21], %23 {strides = array<i32>} : memref<1x8x128xf32, #tpu.memory_space<vmem>>, vector<1x8x128xf32>,
    } else {
    }
    return
  }
  func.func @transform_0(%arg0: i32, %arg1: i32) -> (i32, i32) {
    %c0_i32 = arith.constant 0 : i32
    return %arg0, %arg1 : i32, i32
  }
  func.func @transform_1(%arg0: i32, %arg1: i32) -> (i32, i32) {
    %c0_i32 = arith.constant 0 : i32
    %c0_i32_0 = arith.constant 0 : i32
    return %arg1, %c0_i32 : i32, i32
  }
  func.func @transform_2(%arg0: i32, %arg1: i32) -> (i32, i32) {
    %c0_i32 = arith.constant 0 : i32
    %c0_i32_0 = arith.constant 0 : i32
    return %arg0, %c0_i32 : i32, i32
  }
  func.func @transform_3(%arg0: i32, %arg1: i32) -> (i32, i32, i32) {
    %c0_i32 = arith.constant 0 : i32
    %c0_i32_0 = arith.constant 0 : i32
    %c0_i32_1 = arith.constant 0 : i32
    return %arg0, %c0_i32, %c0_i32_0 : i32, i32, i32
  }
  func.func @transform_4(%arg0: i32, %arg1: i32) -> (i32, i32, i32) {
    %c0_i32 = arith.constant 0 : i32
    %c0_i32_0 = arith.constant 0 : i32
    %c0_i32_1 = arith.constant 0 : i32
    return %arg0, %c0_i32, %c0_i32_0 : i32, i32, i32
  }
}

module attributes {stable_mosaic.version = 11 : i64} {
  func.func @_bn_lrelu_kernel(%arg0: i32, %arg1: memref<128x128xf32, #tpu.memory_space<vmem>>, %arg2: memref<1x128xf32, #tpu.memory_space<vmem>>, %arg3: memref<1x128xf32, #tpu.memory_space<vmem>>, %arg4: memref<128x128xf32, #tpu.memory_space<vmem>>) attributes {dimension_semantics = [#tpu.dimension_semantics<parallel>], iteration_bounds = array<i64: 4>, scalar_prefetch = 0 : i64, scratch_operands = 0 : i64, tpu.core_type = #tpu.core_type<tc>, window_params = [{transform_indices = @transform_0, window_bounds = array<i64: 128, 128>}, {pipeline_mode = #tpu.pipeline_mode<synchronous>, transform_indices = @transform_1, window_bounds = array<i64: 1, 128>}, {pipeline_mode = #tpu.pipeline_mode<synchronous>, transform_indices = @transform_2, window_bounds = array<i64: 1, 128>}, {transform_indices = @transform_3, window_bounds = array<i64: 128, 128>}]} {
    %c0 = arith.constant 0 : index
    %c0_0 = arith.constant 0 : index
    %0 = vector.load %arg1[%c0, %c0_0] : memref<128x128xf32, #tpu.memory_space<vmem>>, vector<128x128xf32>
    %c0_1 = arith.constant 0 : index
    %c0_2 = arith.constant 0 : index
    %1 = vector.load %arg2[%c0_1, %c0_2] : memref<1x128xf32, #tpu.memory_space<vmem>>, vector<1x128xf32>
    %2 = vector.broadcast %1 : vector<1x128xf32> to vector<128x128xf32>
    %3 = arith.mulf %0, %2 : vector<128x128xf32>
    %c0_3 = arith.constant 0 : index
    %c0_4 = arith.constant 0 : index
    %4 = vector.load %arg3[%c0_3, %c0_4] : memref<1x128xf32, #tpu.memory_space<vmem>>, vector<1x128xf32>
    %5 = vector.broadcast %4 : vector<1x128xf32> to vector<128x128xf32>
    %6 = arith.addf %3, %5 : vector<128x128xf32>
    %cst = arith.constant 0.000000e+00 : f32
    %7 = vector.broadcast %cst : f32 to vector<128x128xf32>
    %8 = arith.cmpf ogt, %6, %7 : vector<128x128xf32>
    %cst_5 = arith.constant 1.000000e-01 : f32
    %9 = vector.broadcast %cst_5 : f32 to vector<128x128xf32>
    %10 = arith.mulf %9, %6 : vector<128x128xf32>
    %11 = arith.select %8, %6, %10 : vector<128x128xi1>, vector<128x128xf32>
    %c0_6 = arith.constant 0 : index
    %c0_7 = arith.constant 0 : index
    %12 = vector.load %arg4[%c0_6, %c0_7] : memref<128x128xf32, #tpu.memory_space<vmem>>, vector<128x128xf32>
    tpu.vector_store %arg4[%c0_6, %c0_7], %11 {strides = array<i32>} : memref<128x128xf32, #tpu.memory_space<vmem>>, vector<128x128xf32>,
    return
  }
  func.func @transform_0(%arg0: i32) -> (i32, i32) {
    %c0_i32 = arith.constant 0 : i32
    %c0_i32_0 = arith.constant 0 : i32
    return %arg0, %c0_i32 : i32, i32
  }
  func.func @transform_1(%arg0: i32) -> (i32, i32) {
    %c0_i32 = arith.constant 0 : i32
    %c0_i32_0 = arith.constant 0 : i32
    %c0_i32_1 = arith.constant 0 : i32
    return %c0_i32, %c0_i32_0 : i32, i32
  }
  func.func @transform_2(%arg0: i32) -> (i32, i32) {
    %c0_i32 = arith.constant 0 : i32
    %c0_i32_0 = arith.constant 0 : i32
    %c0_i32_1 = arith.constant 0 : i32
    return %c0_i32, %c0_i32_0 : i32, i32
  }
  func.func @transform_3(%arg0: i32) -> (i32, i32) {
    %c0_i32 = arith.constant 0 : i32
    %c0_i32_0 = arith.constant 0 : i32
    return %arg0, %c0_i32 : i32, i32
  }
}

</mosaic_0001>

<bundles_post_ra>
// kernel: conv_block.3
= control target key start
LH: loop header
LB: loop body
LE: loop exit
PB: predicated region body
PF: predicated region fallthrough
CT: control target
= control target key end

     0   :  { %s405_s12 = smov 0   ;;  %s506_s0 = inlined_call_operand.vmem [shape: f32[512,128], index: 0, kind: input, shape index: {}, may-alias: {0,3}]   ;;  %s507_s1 = inlined_call_operand.vmem [shape: f32[1,128], index: 1, kind: input, shape index: {}]   ;;  %s508_s2 = inlined_call_operand.vmem [shape: f32[1,128], index: 2, kind: input, shape index: {}]   ;;  %s509_s3 = inlined_call_operand.vmem [shape: f32[512,128], index: 3, kind: output, shape index: {}, may-alias: {0,3}]  }
   0x1 LB: > { %s356_s13 = sadd.s32 4294967295, %s383_s12   ;;  %p360_p0 = scmp.ge.s32.totalorder %s383_s12, 1  ;;  %s383_s12 = sphi %s405_s12, %s13_s12  }
   0x2   : > { %p138_p1 = scmp.lt.s32.totalorder %s383_s12, 5 }
   0x4   : > { %p139_p2 = pnand %p360_p0, %p138_p1 }
   0x5   : > { %s361_s14 = sshll.u32 (!%p139_p2), %s356_s13, 4 }
   0x6   : > { %142 = sbr.rel (%p139_p2) target bundleno = 41 (0x29), region = 32  ;;  %p163_p3 = scmp.lt.s32.totalorder (!%p139_p2), %s361_s14, 63 }
   0xb   : > { %s511_s14 = smov (!%p163_p3, %s361_s14), 63  ;;  %v419_v0 = vld [vmem:[%s507_s1] ss:$0 sm:$0xff] }
   0xc   : > { %s362_s15 = sshll.u32 %s511_s14, 3  ;;  %v429_v1 = vld [vmem:[%s508_s2] ss:$0 sm:$0xff] }
   0xd   : > { %s424_s20 = scalar_lea.vmem %s506_s0, %s362_s15  ;;  %s457_s25 = scalar_lea.vmem %s509_s3, %s362_s15 }
   0xe   : > { %v174_v2 = vld [vmem:[%s424_s20] sm:$0xff]  ;;  %v175_v3 = vld [vmem:[%s424_s20 + $0x8] sm:$0xff]  ;;  %v176_v4 = vld [vmem:[%s424_s20 + $0x10] sm:$0xff] }
   0xf   : > { %v177_v5 = vld [vmem:[%s424_s20 + $0x18] sm:$0xff]  ;;  %v178_v6 = vld [vmem:[%s424_s20 + $0x20] sm:$0xff]  ;;  %v179_v7 = vld [vmem:[%s424_s20 + $0x28] sm:$0xff]  ;;  %v197_v8 = vmul.f32 %v419_v0, %v174_v2  ;;  %v198_v9 = vmul.f32 %v419_v0, %v175_v3  ;;  %v199_v10 = vmul.f32 %v419_v0, %v176_v4 }
  0x10   : > { %v180_v11 = vld [vmem:[%s424_s20 + $0x30] sm:$0xff]  ;;  %v181_v12 = vld [vmem:[%s424_s20 + $0x38] sm:$0xff]  ;;  %v200_v13 = vmul.f32 %v419_v0, %v177_v5  ;;  %v201_v14 = vmul.f32 %v419_v0, %v178_v6  ;;  %v202_v15 = vmul.f32 %v419_v0, %v179_v7  ;;  %v182_v20 = vld [vmem:[%s424_s20 + $0x40] sm:$0xff] }
  0x11   : > { %v220_v16 = vadd.f32 %v429_v1, %v197_v8  ;;  %v221_v17 = vadd.f32 %v429_v1, %v198_v9  ;;  %v222_v18 = vadd.f32 %v429_v1, %v199_v10  ;;  %v203_v19 = vmul.f32 %v419_v0, %v180_v11  ;;  %v183_v25 = vld [vmem:[%s424_s20 + $0x48] sm:$0xff]  ;;  %v184_v26 = vld [vmem:[%s424_s20 + $0x50] sm:$0xff]  ;;  %v185_v27 = vld [vmem:[%s424_s20 + $0x58] sm:$0xff] }
  0x12   : > { %v223_v21 = vadd.f32 %v429_v1, %v200_v13  ;;  %v224_v22 = vadd.f32 %v429_v1, %v201_v14  ;;  %v225_v23 = vadd.f32 %v429_v1, %v202_v15  ;;  %v204_v24 = vmul.f32 %v419_v0, %v181_v12  ;;  %v186_v28 = vld [vmem:[%s424_s20 + $0x60] sm:$0xff]  ;;  %v187_v29 = vld [vmem:[%s424_s20 + $0x68] sm:$0xff]  ;;  %v465_v30 = vld [vmem:[%s424_s20 + $0x70] sm:$0xff] }
  0x13   : > { %vm236_vm0 = vcmp.gt.f32.partialorder %v220_v16, 0.0  ;;  %v252_v31 = vmul.f32 0.1, %v220_v16  ;;  %vm237_vm1 = vcmp.gt.f32.partialorder %v221_v17, 0.0  ;;  %vm238_vm2 = vcmp.gt.f32.partialorder %v222_v18, 0.0  ;;  %v189_v34 = vld [vmem:[%s424_s20 + $0x78] sm:$0xff] }
  0x14   : > { %v253_v32 = vmul.f32 0.1, %v221_v17  ;;  %v254_v33 = vmul.f32 0.1, %v222_v18  ;;  %vm239_vm3 = vcmp.gt.f32.partialorder %v223_v21, 0.0  ;;  %vm240_vm4 = vcmp.gt.f32.partialorder %v224_v22, 0.0 }
  0x15   : > { %v268_v35 = vsel %vm236_vm0, %v220_v16, %v252_v31  ;;  %v255_v36 = vmul.f32 0.1, %v223_v21  ;;  %v256_v37 = vmul.f32 0.1, %v224_v22  ;;  %vm241_vm5 = vcmp.gt.f32.partialorder %v225_v23, 0.0 }
  0x16   : > { %284 = vst [vmem:[%s457_s25] sm:$0xff] %v268_v35  ;;  %v269_v38 = vsel %vm237_vm1, %v221_v17, %v253_v32  ;;  %v270_v39 = vsel %vm238_vm2, %v222_v18, %v254_v33  ;;  %v257_v40 = vmul.f32 0.1, %v225_v23  ;;  %v226_v41 = vadd.f32 %v429_v1, %v203_v19 }
  0x17   : > { %285 = vst [vmem:[%s457_s25 + $0x8] sm:$0xff] %v269_v38  ;;  %286 = vst [vmem:[%s457_s25 + $0x10] sm:$0xff] %v270_v39  ;;  %v271_v42 = vsel %vm239_vm3, %v223_v21, %v255_v36  ;;  %v272_v43 = vsel %vm240_vm4, %v224_v22, %v256_v37  ;;  %v227_v44 = vadd.f32 %v429_v1, %v204_v24 }
  0x18   : > { %v205_v45 = vmul.f32 %v419_v0, %v182_v20  ;;  %287 = vst [vmem:[%s457_s25 + $0x18] sm:$0xff] %v271_v42  ;;  %288 = vst [vmem:[%s457_s25 + $0x20] sm:$0xff] %v272_v43  ;;  %v273_v46 = vsel %vm241_vm5, %v225_v23, %v257_v40  ;;  %vm242_vm6 = vcmp.gt.f32.partialorder %v226_v41, 0.0  ;;  %v258_v47 = vmul.f32 0.1, %v226_v41 }
  0x19   : > { %v206_v48 = vmul.f32 %v419_v0, %v183_v25  ;;  %289 = vst [vmem:[%s457_s25 + $0x28] sm:$0xff] %v273_v46  ;;  %vm243_vm7 = vcmp.gt.f32.partialorder %v227_v44, 0.0  ;;  %v259_v49 = vmul.f32 0.1, %v227_v44  ;;  %v207_v51 = vmul.f32 %v419_v0, %v184_v26 }
  0x1a   : > { %v228_v50 = vadd.f32 %v429_v1, %v205_v45  ;;  %v274_v52 = vsel %vm242_vm6, %v226_v41, %v258_v47  ;;  %v208_v54 = vmul.f32 %v419_v0, %v185_v27  ;;  %v209_v55 = vmul.f32 %v419_v0, %v186_v28 }
  0x1b   : > { %v229_v53 = vadd.f32 %v429_v1, %v206_v48  ;;  %290 = vst [vmem:[%s457_s25 + $0x30] sm:$0xff] %v274_v52  ;;  %v275_v56 = vsel %vm243_vm7, %v227_v44, %v259_v49  ;;  %v230_v58 = vadd.f32 %v429_v1, %v207_v51  ;;  %v210_v2 = vmul.f32 %v419_v0, %v187_v29 }
  0x1c   : > { %vm244_vm8 = vcmp.gt.f32.partialorder %v228_v50, 0.0  ;;  %v260_v57 = vmul.f32 0.1, %v228_v50  ;;  %291 = vst [vmem:[%s457_s25 + $0x38] sm:$0xff] %v275_v56  ;;  %v231_v60 = vadd.f32 %v429_v1, %v208_v54  ;;  %v232_v61 = vadd.f32 %v429_v1, %v209_v55 }
  0x1d   : > { %vm245_vm9 = vcmp.gt.f32.partialorder %v229_v53, 0.0  ;;  %v261_v59 = vmul.f32 0.1, %v229_v53  ;;  %vm246_vm10 = vcmp.gt.f32.partialorder %v230_v58, 0.0  ;;  %v262_v63 = vmul.f32 0.1, %v230_v58 }
  0x1e   : > { %v276_v62 = vsel %vm244_vm8, %v228_v50, %v260_v57  ;;  %vm247_vm11 = vcmp.gt.f32.partialorder %v231_v60, 0.0  ;;  %v263_v4 = vmul.f32 0.1, %v231_v60  ;;  %vm248_vm12 = vcmp.gt.f32.partialorder %v232_v61, 0.0 }
  0x1f   : > { %292 = vst [vmem:[%s457_s25 + $0x40] sm:$0xff] %v276_v62  ;;  %v277_v3 = vsel %vm245_vm9, %v229_v53, %v261_v59  ;;  %v278_v5 = vsel %vm246_vm10, %v230_v58, %v262_v63  ;;  %v264_v6 = vmul.f32 0.1, %v232_v61  ;;  %v233_v7 = vadd.f32 %v429_v1, %v210_v2 }
  0x20   : > { %293 = vst [vmem:[%s457_s25 + $0x48] sm:$0xff] %v277_v3  ;;  %v211_v8 = vmul.f32 %v419_v0, %v465_v30  ;;  %294 = vst [vmem:[%s457_s25 + $0x50] sm:$0xff] %v278_v5  ;;  %v279_v9 = vsel %vm247_vm11, %v231_v60, %v263_v4  ;;  %v212_v10 = vmul.f32 %v419_v0, %v189_v34 }
  0x21   : > { %295 = vst [vmem:[%s457_s25 + $0x58] sm:$0xff] %v279_v9  ;;  %v280_v11 = vsel %vm248_vm12, %v232_v61, %v264_v6  ;;  %vm249_vm13 = vcmp.gt.f32.partialorder %v233_v7, 0.0  ;;  %v265_v12 = vmul.f32 0.1, %v233_v7 }
  0x22   : > { %v234_v13 = vadd.f32 %v429_v1, %v211_v8  ;;  %296 = vst [vmem:[%s457_s25 + $0x60] sm:$0xff] %v280_v11  ;;  %v235_v14 = vadd.f32 %v429_v1, %v212_v10 }
  0x23   : > { %v281_v15 = vsel %vm249_vm13, %v233_v7, %v265_v12 }
  0x24   : > { %vm250_vm14 = vcmp.gt.f32.partialorder %v234_v13, 0.0  ;;  %v266_v16 = vmul.f32 0.1, %v234_v13  ;;  %297 = vst [vmem:[%s457_s25 + $0x68] sm:$0xff] %v281_v15  ;;  %vm251_vm15 = vcmp.gt.f32.partialorder %v235_v14, 0.0 }
  0x25   : > { %v267_v17 = vmul.f32 0.1, %v235_v14 }
  0x26   : > { %v282_v18 = vsel %vm250_vm14, %v234_v13, %v266_v16 }
  0x27   : > { %298 = vst [vmem:[%s457_s25 + $0x70] sm:$0xff] %v282_v18  ;;  %v283_v19 = vsel %vm251_vm15, %v235_v14, %v267_v17 }
  0x28   : > { %299 = vst [vmem:[%s457_s25 + $0x78] sm:$0xff] %v283_v19 }
  0x29 PF: > { %s13_s12 = sadd.s32 1, %s383_s12  }
  0x2a   : > { %p10_p4 = scmp.ge.s32.totalorder %s13_s12, 6  }
  0x2c   :  { %12 = sbr.rel (!%p10_p4) target bundleno = 1 (0x1), region = 62 }

// kernel: conv_block.2
= control target key start
LH: loop header
LB: loop body
LE: loop exit
PB: predicated region body
PF: predicated region fallthrough
CT: control target
= control target key end

     0   :  { %s963_s15 = smov 0   ;;  %s965_s16 = smov 0   ;;  %s1081_s0 = inlined_call_operand.vmem [shape: f32[512,36], index: 0, kind: input, shape index: {}]   ;;  %s1082_s1 = inlined_call_operand.vmem [shape: f32[36,128], index: 1, kind: input, shape index: {}]   ;;  %s1083_s2 = inlined_call_operand.vmem [shape: f32[512,128], index: 2, kind: output, shape index: {0}]   ;;  %s1084_s3 = inlined_call_operand.vmem [shape: f32[4,8,128], index: 3, kind: output, shape index: {1}]   ;;  %s1085_s4 = inlined_call_operand.vmem [shape: f32[4,8,128], index: 4, kind: output, shape index: {2}]  }
   0x1   :  { %s967_s17 = smov 0  }
   0x2 LB: > { %s27_s18 = sadd.s32 1, %s932_s16  ;;  %p799_p0 = scmp.ge.s32.totalorder %s936_s17, 1  ;;  %s936_s17 = sphi %s967_s17, %s15_s17   ;;  %s932_s16 = sphi %s965_s16, %s1087_s16   ;;  %s928_s15 = sphi %s963_s15, %s1086_s15  }
   0x3   : > { %p29_p1 = scmp.ge.s32.totalorder %s27_s18, 4  ;;  %p196_p2 = scmp.lt.s32.totalorder %s936_s17, 5 }
   0x5   : > { %s1089_s18 = smov (%p29_p1, %s27_s18), 0  ;;  %p197_p3 = pnand %p799_p0, %p196_p2 }
   0x6   : > { %s800_s23 = sshll.u32 (!%p197_p3), %s928_s15, 4  ;;  %p259_p5 = scmp.lt.s32.totalorder (!%p197_p3), %s928_s15, 3 }
   0x7   : > { %200 = sbr.rel (%p197_p3) target bundleno = 265 (0x109), region = 28  ;;  %p239_p4 = scmp.lt.s32.totalorder (!%p197_p3), %s800_s23, 63 }
   0xc   : > { %v323_v0 = vld [vmem:[%s1082_s1 + $0x20] sm:$0xf]  ;;  %vm373_vm0 = vcmask 1043456   ;;  %v322_v1 = vld [vmem:[%s1082_s1 + $0x18] sm:$0xff]  ;;  %v321_v2 = vld [vmem:[%s1082_s1 + $0x10] sm:$0xff]  ;;  %s1091_s23 = smov (!%p239_p4, %s800_s23), 63 }
   0xd   : > { %846 = vmatprep.subr.msk.mxu0 %vm373_vm0, %v323_v0  ;;  %880 = vmatprep.subr.msk.mxu1 %vm373_vm0, %v323_v0  ;;  %v320_v3 = vld [vmem:[%s1082_s1 + $0x8] sm:$0xff]  ;;  %s801_s28 = sshll.u32 %s1091_s23, 3  ;;  %vm324_vm1 = vcmask 293888   ;;  %v319_v4 = vld [vmem:[%s1082_s1] sm:$0xff]  ;;  %s1093_s15 = smov (!%p259_p5, %s928_s15), 3 }
   0xe   : > { %847 = vmatpush3.msk.msra.mxu0 %vm373_vm0, %v323_v0  ;;  %885 = vmatpush3.msk.msra.mxu1 %vm373_vm0, %v323_v0  ;;  %s1007_s7 = scalar_lea.vmem %s1081_s0, %s801_s28  ;;  %s1046_s10 = scalar_lea.vmem %s1083_s2, %s801_s28 }
   0xf   : > { %848 = vmatprep.subr.mxu0 %v322_v1  ;;  %881 = vmatprep.subr.mxu1 %v322_v1  ;;  %v303_v5 = vld [vmem:[%s1007_s7] sm:$0xff]  ;;  %v304_v6 = vld [vmem:[%s1007_s7 + $0x8] sm:$0xff]  ;;  %v305_v7 = vld [vmem:[%s1007_s7 + $0x10] sm:$0xff]  ;;  %s804_s11 = sshll.u32 %s1093_s15, 3 }
  0x10   : > { %849 = vmatpush3.msra.mxu0 %v322_v1  ;;  %886 = vmatpush3.msra.mxu1 %v322_v1  ;;  %v311_v8 = vld [vmem:[%s1007_s7 + $0x40] sm:$0xff]  ;;  %v312_v9 = vld [vmem:[%s1007_s7 + $0x48] sm:$0xff]  ;;  %v313_v10 = vld [vmem:[%s1007_s7 + $0x50] sm:$0xff]  ;;  %s262_s14 = scalar_lea.vmem %s1084_s3, %s804_s11  ;;  %s266_s21 = scalar_lea.vmem %s1085_s4, %s804_s11 }
  0x11   : > { %850 = vmatprep.subr.mxu0 %v321_v2  ;;  %882 = vmatprep.subr.mxu1 %v321_v2  ;;  %v306_v11 = vld [vmem:[%s1007_s7 + $0x18] sm:$0xff]  ;;  %v307_v12 = vld [vmem:[%s1007_s7 + $0x20] sm:$0xff]  ;;  %v308_v15 = vld [vmem:[%s1007_s7 + $0x28] sm:$0xff] }
  0x12   : > { %851 = vmatpush3.msra.mxu0 %v321_v2  ;;  %887 = vmatpush3.msra.mxu1 %v321_v2  ;;  %v314_v13 = vld [vmem:[%s1007_s7 + $0x58] sm:$0xff]  ;;  %v315_v14 = vld [vmem:[%s1007_s7 + $0x60] sm:$0xff]  ;;  %v309_v16 = vld [vmem:[%s1007_s7 + $0x30] sm:$0xff] }
  0x13   : > { %852 = vmatprep.subr.mxu0 %v320_v3  ;;  %883 = vmatprep.subr.mxu1 %v320_v3  ;;  %v316_v17 = vld [vmem:[%s1007_s7 + $0x68] sm:$0xff]  ;;  %v317_v18 = vld [vmem:[%s1007_s7 + $0x70] sm:$0xff]  ;;  %v310_v19 = vld [vmem:[%s1007_s7 + $0x38] sm:$0xff] }
  0x14   : > { %853 = vmatpush3.msra.mxu0 %v320_v3  ;;  %856 = vmatprep.mubr.msk.f32.mxu0 %vm324_vm1, %v303_v5  ;;  %v318_v20 = vld [vmem:[%s1007_s7 + $0x78] sm:$0xff] }
  0x15   : > { %854 = vmatprep.subr.mxu0 %v319_v4  ;;  %888 = vmatpush3.msra.mxu1 %v320_v3 }
  0x16   : > { %855 = vmatpush3.msra.mxu0 %v319_v4  ;;  %884 = vmatprep.subr.mxu1 %v319_v4 }
  0x17   : > { %857 = vmatmul.mubr.msk.f32.vlgmr.msra.gmra.mxu0 %vm324_vm1, %v304_v6  ;;  %889 = vmatpush3.msra.mxu1 %v319_v4 }
  0x18   : > { %859 = vmatprep.mubr.msk.f32.mxu0 %vm324_vm1, %v305_v7  ;;  %868 = vmatprep.mubr.msk.f32.mxu1 %vm324_vm1, %v311_v8 }
  0x19   : > { %869 = vmatmul.mubr.msk.f32.vlgmr.msra.gmra.mxu1 %vm324_vm1, %v312_v9 }
  0x1a   : > { %871 = vmatprep.mubr.msk.f32.mxu1 %vm324_vm1, %v313_v10 }
  0x1b   : > { %860 = vmatmul.mubr.msk.f32.gmra.mxu0 %vm324_vm1, %v306_v11 }
  0x1c   : > { %862 = vmatprep.mubr.msk.f32.mxu0 %vm324_vm1, %v307_v12 }
  0x1d   : > { %872 = vmatmul.mubr.msk.f32.gmra.mxu1 %vm324_vm1, %v314_v13 }
  0x1e   : > { %874 = vmatprep.mubr.msk.f32.mxu1 %vm324_vm1, %v315_v14 }
  0x1f   : > { %863 = vmatmul.mubr.msk.f32.gmra.mxu0 %vm324_vm1, %v308_v15 }
  0x20   : > { %865 = vmatprep.mubr.msk.f32.mxu0 %vm324_vm1, %v309_v16 }
  0x21   : > { %875 = vmatmul.mubr.msk.f32.gmra.mxu1 %vm324_vm1, %v316_v17 }
  0x22   : > { %877 = vmatprep.mubr.msk.f32.mxu1 %vm324_vm1, %v317_v18 }
  0x23   : > { %866 = vmatmul.mubr.msk.f32.gmra.mxu0 %vm324_vm1, %v310_v19 }
  0x25   : > { %878 = vmatmul.mubr.msk.f32.gmra.mxu1 %vm324_vm1, %v318_v20 }
  0xd7   : > { %v858_v21 = vpop.f32.mrf.mxu0 }
  0xd8   : > { %574 = vst [vmem:[%s1046_s10 + $0x8] sm:$0xff] %v858_v21  ;;  %v611_v27 = vmul.f32 %v858_v21, %v858_v21 }
  0xd9   : > { %v443_v22 = vpop.f32.mrf.mxu0  ;;  %v870_v23 = vpop.f32.mrf.mxu1 }
  0xda   : > { %573 = vst [vmem:[%s1046_s10] sm:$0xff] %v443_v22  ;;  %v610_v24 = vmul.f32 %v443_v22, %v443_v22  ;;  %582 = vst [vmem:[%s1046_s10 + $0x48] sm:$0xff] %v870_v23  ;;  %v589_v28 = vadd.f32 %v858_v21, %v443_v22  ;;  %v619_v61 = vmul.f32 %v870_v23, %v870_v23 }
  0xdb   : > { %v861_v25 = vpop.f32.mrf.mxu0  ;;  %v483_v26 = vpop.f32.mrf.mxu1 }
  0xdc   : > { %576 = vst [vmem:[%s1046_s10 + $0x18] sm:$0xff] %v861_v25  ;;  %581 = vst [vmem:[%s1046_s10 + $0x40] sm:$0xff] %v483_v26  ;;  %v626_v31 = vadd.f32 %v611_v27, %v610_v24  ;;  %v613_v36 = vmul.f32 %v861_v25, %v861_v25  ;;  %v618_v60 = vmul.f32 %v483_v26, %v483_v26 }
  0xdd   : > { %v453_v29 = vpop.f32.mrf.mxu0  ;;  %v873_v30 = vpop.f32.mrf.mxu1 }
  0xde   : > { %575 = vst [vmem:[%s1046_s10 + $0x10] sm:$0xff] %v453_v29  ;;  %v590_v32 = vadd.f32 %v589_v28, %v453_v29  ;;  %v612_v33 = vmul.f32 %v453_v29, %v453_v29  ;;  %584 = vst [vmem:[%s1046_s10 + $0x58] sm:$0xff] %v873_v30  ;;  %v621_v3 = vmul.f32 %v873_v30, %v873_v30 }
  0xdf   : > { %v864_v34 = vpop.f32.mrf.mxu0  ;;  %v493_v35 = vpop.f32.mrf.mxu1 }
  0xe0   : > { %v627_v37 = vadd.f32 %v626_v31, %v612_v33  ;;  %578 = vst [vmem:[%s1046_s10 + $0x28] sm:$0xff] %v864_v34  ;;  %v591_v38 = vadd.f32 %v861_v25, %v590_v32  ;;  %583 = vst [vmem:[%s1046_s10 + $0x50] sm:$0xff] %v493_v35  ;;  %v615_v46 = vmul.f32 %v864_v34, %v864_v34 }
  0xe1   : > { %v463_v39 = vpop.f32.mrf.mxu0  ;;  %v876_v40 = vpop.f32.mrf.mxu1  ;;  %v620_v1 = vmul.f32 %v493_v35, %v493_v35 }
  0xe2   : > { %577 = vst [vmem:[%s1046_s10 + $0x20] sm:$0xff] %v463_v39  ;;  %v592_v41 = vadd.f32 %v591_v38, %v463_v39  ;;  %v614_v42 = vmul.f32 %v463_v39, %v463_v39  ;;  %v628_v43 = vadd.f32 %v627_v37, %v613_v36  ;;  %586 = vst [vmem:[%s1046_s10 + $0x68] sm:$0xff] %v876_v40 }
  0xe3   : > { %v867_v44 = vpop.f32.mrf.mxu0  ;;  %v503_v45 = vpop.f32.mrf.mxu1  ;;  %v623_v9 = vmul.f32 %v876_v40, %v876_v40 }
  0xe4   : > { %v629_v47 = vadd.f32 %v628_v43, %v614_v42  ;;  %580 = vst [vmem:[%s1046_s10 + $0x38] sm:$0xff] %v867_v44  ;;  %v593_v48 = vadd.f32 %v864_v34, %v592_v41  ;;  %585 = vst [vmem:[%s1046_s10 + $0x60] sm:$0xff] %v503_v45  ;;  %v617_v55 = vmul.f32 %v867_v44, %v867_v44 }
  0xe5   : > { %v473_v49 = vpop.f32.mrf.mxu0  ;;  %v879_v50 = vpop.f32.mrf.mxu1  ;;  %v622_v7 = vmul.f32 %v503_v45, %v503_v45 }
  0xe6   : > { %579 = vst [vmem:[%s1046_s10 + $0x30] sm:$0xff] %v473_v49  ;;  %v594_v51 = vadd.f32 %v593_v48, %v473_v49  ;;  %v616_v52 = vmul.f32 %v473_v49, %v473_v49  ;;  %v630_v53 = vadd.f32 %v629_v47, %v615_v46  ;;  %588 = vst [vmem:[%s1046_s10 + $0x78] sm:$0xff] %v879_v50 }
  0xe7   : > { %v513_v54 = vpop.f32.mrf.mxu1  ;;  %v625_v15 = vmul.f32 %v879_v50, %v879_v50 }
  0xe8   : > { %v595_v56 = vadd.f32 %v867_v44, %v594_v51  ;;  %v631_v57 = vadd.f32 %v630_v53, %v616_v52  ;;  %587 = vst [vmem:[%s1046_s10 + $0x70] sm:$0xff] %v513_v54  ;;  %v624_v13 = vmul.f32 %v513_v54, %v513_v54 }
  0xea   : > { %v632_v58 = vadd.f32 %v631_v57, %v617_v55  ;;  %v596_v59 = vadd.f32 %v595_v56, %v483_v26 }
  0xec   : > { %v633_v62 = vadd.f32 %v632_v58, %v618_v60  ;;  %v597_v63 = vadd.f32 %v870_v23, %v596_v59 }
  0xee   : > { %v598_v0 = vadd.f32 %v597_v63, %v493_v35  ;;  %v634_v2 = vadd.f32 %v633_v62, %v619_v61 }
  0xf0   : > { %v635_v4 = vadd.f32 %v634_v2, %v620_v1  ;;  %v599_v5 = vadd.f32 %v873_v30, %v598_v0 }
  0xf2   : > { %v600_v6 = vadd.f32 %v599_v5, %v503_v45  ;;  %v636_v8 = vadd.f32 %v635_v4, %v621_v3 }
  0xf4   : > { %v637_v10 = vadd.f32 %v636_v8, %v622_v7  ;;  %v601_v11 = vadd.f32 %v876_v40, %v600_v6 }
  0xf6   : > { %v602_v12 = vadd.f32 %v601_v11, %v513_v54  ;;  %v638_v14 = vadd.f32 %v637_v10, %v623_v9 }
  0xf8   : > { %v603_v16 = vadd.f32 %v879_v50, %v602_v12  ;;  %v639_v17 = vadd.f32 %v638_v14, %v624_v13 }
  0xfa   : > { %v604_v18 = vrot.slane %v603_v16, 4  ;;  %v640_v19 = vadd.f32 %v639_v17, %v625_v15 }
  0xfc   : > { %v605_v20 = vadd.f32 %v604_v18, %v603_v16  ;;  %v641_v21 = vrot.slane %v640_v19, 4 }
  0xfe   : > { %v606_v22 = vrot.slane %v605_v20, 2  ;;  %v642_v23 = vadd.f32 %v641_v21, %v640_v19 }
 0x100   : > { %v607_v24 = vadd.f32 %v606_v22, %v605_v20  ;;  %v643_v25 = vrot.slane %v642_v23, 2 }
 0x102   : > { %v608_v26 = vrot.slane %v607_v24, 1  ;;  %v644_v27 = vadd.f32 %v643_v25, %v642_v23 }
 0x104   : > { %v609_v28 = vadd.f32 %v608_v26, %v607_v24  ;;  %v645_v29 = vrot.slane %v644_v27, 1 }
 0x106   : > { %v646_v30 = vadd.f32 %v645_v29, %v644_v27  ;;  %647 = vst [vmem:[%s262_s14] sm:$0xff] %v609_v28 }
 0x108   : > { %648 = vst [vmem:[%s266_s21] sm:$0xff] %v646_v30 }
 0x109 PF: > { %s15_s17 = sadd.s32 1, %s936_s17   ;;  %s1086_s15 = smov %s932_s16 }
 0x10a   : > { %p12_p6 = scmp.ge.s32.totalorder %s15_s17, 6   ;;  %s1087_s16 = smov %s1089_s18 }
 0x10c   :  { %14 = sbr.rel (!%p12_p6) target bundleno = 2 (0x2), region = 93 }

</bundles_post_ra>
